<compile_context>
chip_gen: v6e
topology: v6e:2x2x1
jax: 0.10.0
libtpu: 0.0.40
codegen_flags: <defaults>
</compile_context>

<pallas_src>
import functools

import jax
import jax.numpy as jnp
from jax.experimental import pallas as pl
from jax.experimental.pallas import tpu as pltpu

PAD = 0


def _round_up(x, m):
    return ((x + m - 1) // m) * m


def _vocab_tiling(V):
    """Pick a lane-dense vocab tile and padded vocab width (multiple of the tile)."""
    MAX_TILE = 2048          # ~2-4k good on v5e/v6e, 1-2k on v7x; 2048 is a safe middle ground
    Vp128 = _round_up(V, 128)
    if Vp128 <= MAX_TILE:
        return Vp128, Vp128                      # single tile
    return MAX_TILE, _round_up(V, MAX_TILE)


# -----------------------------------------------------------------------------
# Kernel 1: single-step GRU cell (grid-less; everything resident once in VMEM)
# -----------------------------------------------------------------------------
def gru_kernel(x_ref,                      # (Bp, Hp) bf16 gathered embeddings
               h_ref,                      # (Bp, Hp) f32 previous hidden
               wih_ref, whh_ref,           # (Hp, 3*Hp) bf16 gate weights (r,z,n lane blocks)
               bfold_ref,                  # (1, 3*Hp) f32: [b_ih_r+b_hh_r | b_ih_z+b_hh_z | b_ih_n]
               bhhn_ref,                   # (1, Hp)   f32: b_hh_n
               hnew_ref, hbf_ref):         # outputs: (Bp, Hp) f32 / (Bp, Hp) bf16
    Hp = h_ref.shape[-1]
    x_bf = x_ref[...]                                  # already bf16
    h = h_ref[...]                                     # f32 elementwise path
    h_bf = h.astype(jnp.bfloat16)

    gi = jnp.dot(x_bf, wih_ref[...], preferred_element_type=jnp.float32) + bfold_ref[...]
    gh = jnp.dot(h_bf, whh_ref[...], preferred_element_type=jnp.float32)

    # Gate blocks are lane-aligned at 128 boundaries -> whole-vreg slices.
    r = jax.nn.sigmoid(gi[:, 0:Hp] + gh[:, 0:Hp])
    z = jax.nn.sigmoid(gi[:, Hp:2 * Hp] + gh[:, Hp:2 * Hp])
    n = jnp.tanh(gi[:, 2 * Hp:3 * Hp] + r * (gh[:, 2 * Hp:3 * Hp] + bhhn_ref[...]))
    h_new = (1.0 - z) * n + z * h                      # f32 blend (PyTorch GRU)

    hnew_ref[...] = h_new
    hbf_ref[...] = h_new.astype(jnp.bfloat16)          # MXU operand for the projection


# -----------------------------------------------------------------------------
# Kernel 2: vocab projection, one lane-dense vocab tile per grid step (parallel)
# -----------------------------------------------------------------------------
def proj_kernel(hbf_ref, wout_ref, bout_ref, logits_ref):
    logits_ref[...] = (
        jnp.dot(hbf_ref[...], wout_ref[...], preferred_element_type=jnp.float32)
        + bout_ref[...]
    )


# -----------------------------------------------------------------------------
# Wrapper
# -----------------------------------------------------------------------------
@functools.partial(jax.jit, static_argnames=("output_size",))
def decoder_forward(params, seqs, hidden, *, output_size):
    """
    Args:
      params: kernel-layout params from init_decoder_params()[0].
      seqs:   (1, B) int32 token ids.
      hidden: (1, B, H) float32 initial hidden state.
    Returns:
      output: (1, B, V) float32
      hidden: (1, B, H) float32
    """
    B = seqs.shape[1]
    H = hidden.shape[2]
    V = output_size

    Hp = params["W_hh_T"].shape[0]
    TILE_V, Vp = _vocab_tiling(V)
    assert params["b_out"].shape[1] == Vp
    num_v_tiles = Vp // TILE_V
    Bp = _round_up(B, 16)                    # bf16 native sublane packing is (16, 128)

    # Embedding gather in the wrapper: only B bf16 rows leave HBM (not the table).
    ids = seqs[0].astype(jnp.int32)
    x = jnp.take(params["embedding"], ids, axis=0)        # (B, Hp) bf16
    x = jnp.pad(x, ((0, Bp - B), (0, 0)))
    h0 = jnp.pad(hidden[0].astype(jnp.float32), ((0, Bp - B), (0, Hp - H)))

    # ---- GRU cell -----------------------------------------------------------
    h_new, h_new_bf = pl.pallas_call(
        gru_kernel,
        out_shape=(jax.ShapeDtypeStruct((Bp, Hp), jnp.float32),
                   jax.ShapeDtypeStruct((Bp, Hp), jnp.bfloat16)),
    )(x, h0, params["W_ih_T"], params["W_hh_T"], params["b_fold"], params["b_hh_n"])

    # ---- vocab projection ---------------------------------------------------
    # vmem_limit from actual buffer sizes (double-buffered tiles) + headroom.
    wout_tile_b = Hp * TILE_V * 2 * 2                 # bf16, 2 buffers
    bout_tile_b = 8 * TILE_V * 4 * 2                  # sublane-padded f32, 2 buffers
    logits_tile_b = Bp * TILE_V * 4 * 2
    hbf_b = Bp * Hp * 2 * 2
    vmem_limit = min(64 * 1024 * 1024,
                     2 * (wout_tile_b + bout_tile_b + logits_tile_b + hbf_b)
                     + 8 * 1024 * 1024)

    logits_p = pl.pallas_call(
        proj_kernel,
        grid=(num_v_tiles,),
        in_specs=[
            pl.BlockSpec((Bp, Hp), lambda j: (0, 0)),         # h_new bf16 (tiny, invariant)
            pl.BlockSpec((Hp, TILE_V), lambda j: (0, j)),     # W_out_T vocab tile
            pl.BlockSpec((1, TILE_V), lambda j: (0, j)),      # b_out vocab tile
        ],
        out_specs=pl.BlockSpec((Bp, TILE_V), lambda j: (0, j)),
        out_shape=jax.ShapeDtypeStruct((Bp, Vp), jnp.float32),
        compiler_params=pltpu.CompilerParams(
            # No carried state -> vocab axis is truly parallel (both TCs on v7x).
            dimension_semantics=("parallel",),
            vmem_limit_bytes=vmem_limit,
        ),
    )(h_new_bf, params["W_out_T"], params["b_out"])

    output = logits_p[:B, :V][None, ...]
    hidden_new = h_new[:B, :H][None, ...]
    return output, hidden_new


# -----------------------------------------------------------------------------
# Parameter init (PyTorch-shaped raw weights + padded/lane-aligned kernel layout)
# -----------------------------------------------------------------------------
def init_decoder_params(key, hidden_size, output_size):
    H, V = hidden_size, output_size
    Hp = _round_up(H, 128)
    _, Vp = _vocab_tiling(V)

    ks = jax.random.split(key, 7)
    scale = 1.0 / jnp.sqrt(jnp.float32(H))

    embedding = jax.random.normal(ks[0], (V, H), jnp.float32) * 0.1
    embedding = embedding.at[PAD].set(0.0)                  # padding_idx=PAD -> zero row

    # PyTorch GRU weights: weight_ih_l0 (3H, H), weight_hh_l0 (3H, H), gate order r,z,n.
    W_ih = jax.random.uniform(ks[1], (3 * H, H), jnp.float32, -scale, scale)
    W_hh = jax.random.uniform(ks[2], (3 * H, H), jnp.float32, -scale, scale)
    b_ih = jax.random.uniform(ks[3], (3 * H,), jnp.float32, -scale, scale)
    b_hh = jax.random.uniform(ks[4], (3 * H,), jnp.float32, -scale, scale)
    # nn.Linear(H, V): weight (V, H), bias (V,)
    W_out = jax.random.uniform(ks[5], (V, H), jnp.float32, -scale, scale)
    b_out = jax.random.uniform(ks[6], (V,), jnp.float32, -scale, scale)

    raw = dict(embedding=embedding, W_ih=W_ih, W_hh=W_hh,
               b_ih=b_ih, b_hh=b_hh, W_out=W_out, b_out=b_out)

    # ---- kernel layout: each gate padded to its own 128-wide lane block ----
    emb_p = jnp.zeros((V, Hp), jnp.float32).at[:, :H].set(embedding).astype(jnp.bfloat16)

    wih_p = jnp.zeros((Hp, 3 * Hp), jnp.float32)
    whh_p = jnp.zeros((Hp, 3 * Hp), jnp.float32)
    for g in range(3):                                      # r, z, n
        wih_p = wih_p.at[:H, g * Hp:g * Hp + H].set(W_ih[g * H:(g + 1) * H, :].T)
        whh_p = whh_p.at[:H, g * Hp:g * Hp + H].set(W_hh[g * H:(g + 1) * H, :].T)

    # Fold b_ih + b_hh for the r, z gates (the n gate needs b_hh_n inside r*(...)).
    b_fold = jnp.zeros((1, 3 * Hp), jnp.float32)
    b_fold = b_fold.at[0, 0 * Hp:0 * Hp + H].set(b_ih[0:H] + b_hh[0:H])
    b_fold = b_fold.at[0, 1 * Hp:1 * Hp + H].set(b_ih[H:2 * H] + b_hh[H:2 * H])
    b_fold = b_fold.at[0, 2 * Hp:2 * Hp + H].set(b_ih[2 * H:3 * H])
    b_hh_n = jnp.zeros((1, Hp), jnp.float32).at[0, :H].set(b_hh[2 * H:3 * H])

    wout_p = jnp.zeros((Hp, Vp), jnp.float32).at[:H, :V].set(W_out.T)
    bout_p = jnp.zeros((1, Vp), jnp.float32).at[0, :V].set(b_out)

    params = dict(
        embedding=emb_p,                                    # (V, Hp) bf16 (gathered in wrapper)
        W_ih_T=wih_p.astype(jnp.bfloat16),                  # bf16 MXU weights
        W_hh_T=whh_p.astype(jnp.bfloat16),
        b_fold=b_fold,
        b_hh_n=b_hh_n,
        W_out_T=wout_p.astype(jnp.bfloat16),
        b_out=bout_p,
    )
    return params, raw


# -----------------------------------------------------------------------------
# Pure-JAX reference (same bf16-weight / f32-accumulate numerics) for validation
# -----------------------------------------------------------------------------
def decoder_reference(raw, seqs, hidden):
    H = hidden.shape[2]
    x = jnp.take(raw["embedding"], seqs[0], axis=0)         # (B, H)
    h = hidden[0]

    wih_bf = raw["W_ih"].astype(jnp.bfloat16)
    whh_bf = raw["W_hh"].astype(jnp.bfloat16)
    wout_bf = raw["W_out"].astype(jnp.bfloat16)

    gi = jnp.dot(x.astype(jnp.bfloat16), wih_bf.T,
                 preferred_element_type=jnp.float32) + raw["b_ih"]
    gh = jnp.dot(h.astype(jnp.bfloat16), whh_bf.T,
                 preferred_element_type=jnp.float32) + raw["b_hh"]

    r = jax.nn.sigmoid(gi[:, :H] + gh[:, :H])
    z = jax.nn.sigmoid(gi[:, H:2 * H] + gh[:, H:2 * H])
    n = jnp.tanh(gi[:, 2 * H:] + r * gh[:, 2 * H:])
    h_new = (1.0 - z) * n + z * h

    out = jnp.dot(h_new.astype(jnp.bfloat16), wout_bf.T,
                  preferred_element_type=jnp.float32) + raw["b_out"]
    return out[None], h_new[None]


if __name__ == "__main__":
    hidden_size = 32     # H
    output_size = 64     # V (target-language vocab)
    batch_size = 8       # B

    key = jax.random.PRNGKey(0)
    k_par, k_seq, k_hid = jax.random.split(key, 3)

    params, raw = init_decoder_params(k_par, hidden_size, output_size)
    seqs = jax.random.randint(k_seq, (1, batch_size), 0, output_size, jnp.int32)
    hidden0 = jax.random.normal(k_hid, (1, batch_size, hidden_size), jnp.float32)

    out, hid = decoder_forward(params, seqs, hidden0, output_size=output_size)
    out = jax.block_until_ready(out)
    hid = jax.block_until_ready(hid)

    ref_out, ref_hid = decoder_reference(raw, seqs, hidden0)

    assert out.shape == (1, batch_size, output_size)
    assert hid.shape == (1, batch_size, hidden_size)
    assert jnp.allclose(hid, ref_hid, atol=1e-4), "hidden mismatch"
    assert jnp.allclose(out, ref_out, atol=5e-3), "output mismatch"

    print("KERNEL_OK")
</pallas_src>

<mosaic_0001>
module attributes {stable_mosaic.version = 11 : i64} {
  func.func @proj_kernel(%arg0: i32, %arg1: memref<16x128xbf16, #tpu.memory_space<vmem>>, %arg2: memref<128x128xbf16, #tpu.memory_space<vmem>>, %arg3: memref<1x128xf32, #tpu.memory_space<vmem>>, %arg4: memref<16x128xf32, #tpu.memory_space<vmem>>) attributes {dimension_semantics = [#tpu.dimension_semantics<parallel>], iteration_bounds = array<i64: 1>, scalar_prefetch = 0 : i64, scratch_operands = 0 : i64, tpu.core_type = #tpu.core_type<tc>, window_params = [{pipeline_mode = #tpu.pipeline_mode<synchronous>, transform_indices = @transform_0, window_bounds = array<i64: 16, 128>}, {transform_indices = @transform_1, window_bounds = array<i64: 128, 128>}, {transform_indices = @transform_2, window_bounds = array<i64: 1, 128>}, {transform_indices = @transform_3, window_bounds = array<i64: 16, 128>}]} {
    %c0 = arith.constant 0 : index
    %c0_0 = arith.constant 0 : index
    %0 = vector.load %arg1[%c0, %c0_0] : memref<16x128xbf16, #tpu.memory_space<vmem>>, vector<16x128xbf16>
    %c0_1 = arith.constant 0 : index
    %c0_2 = arith.constant 0 : index
    %1 = vector.load %arg2[%c0_1, %c0_2] : memref<128x128xbf16, #tpu.memory_space<vmem>>, vector<128x128xbf16>
    %cst = arith.constant dense<0.000000e+00> : vector<16x128xf32>
    %2 = tpu.matmul %0, %1, %cst {dimension_numbers = #tpu.dot_dimension_numbers<[1], [0], [0], [1], [0, 0, 1, 1], [], []>} : vector<16x128xbf16>, vector<128x128xbf16>, vector<16x128xf32> -> vector<16x128xf32>
    %c0_3 = arith.constant 0 : index
    %c0_4 = arith.constant 0 : index
    %3 = vector.load %arg3[%c0_3, %c0_4] : memref<1x128xf32, #tpu.memory_space<vmem>>, vector<1x128xf32>
    %4 = vector.broadcast %3 : vector<1x128xf32> to vector<16x128xf32>
    %5 = arith.addf %2, %4 : vector<16x128xf32>
    %c0_5 = arith.constant 0 : index
    %c0_6 = arith.constant 0 : index
    %6 = vector.load %arg4[%c0_5, %c0_6] : memref<16x128xf32, #tpu.memory_space<vmem>>, vector<16x128xf32>
    tpu.vector_store %arg4[%c0_5, %c0_6], %5 {strides = array<i32>} : memref<16x128xf32, #tpu.memory_space<vmem>>, vector<16x128xf32>,
    return
  }
  func.func @transform_0(%arg0: i32) -> (i32, i32) {
    %c0_i32 = arith.constant 0 : i32
    %c0_i32_0 = arith.constant 0 : i32
    %c0_i32_1 = arith.constant 0 : i32
    return %c0_i32, %c0_i32_0 : i32, i32
  }
  func.func @transform_1(%arg0: i32) -> (i32, i32) {
    %c0_i32 = arith.constant 0 : i32
    %c0_i32_0 = arith.constant 0 : i32
    return %c0_i32, %arg0 : i32, i32
  }
  func.func @transform_2(%arg0: i32) -> (i32, i32) {
    %c0_i32 = arith.constant 0 : i32
    %c0_i32_0 = arith.constant 0 : i32
    return %c0_i32, %arg0 : i32, i32
  }
  func.func @transform_3(%arg0: i32) -> (i32, i32) {
    %c0_i32 = arith.constant 0 : i32
    %c0_i32_0 = arith.constant 0 : i32
    return %c0_i32, %arg0 : i32, i32
  }
}

module attributes {stable_mosaic.version = 11 : i64} {
  func.func @gru_kernel(%arg0: memref<16x128xbf16, #tpu.memory_space<vmem>>, %arg1: memref<16x128xf32, #tpu.memory_space<vmem>>, %arg2: memref<128x384xbf16, #tpu.memory_space<vmem>>, %arg3: memref<128x384xbf16, #tpu.memory_space<vmem>>, %arg4: memref<1x384xf32, #tpu.memory_space<vmem>>, %arg5: memref<1x128xf32, #tpu.memory_space<vmem>>, %arg6: memref<16x128xf32, #tpu.memory_space<vmem>>, %arg7: memref<16x128xbf16, #tpu.memory_space<vmem>>) attributes {dimension_semantics = [], scalar_prefetch = 0 : i64, scratch_operands = 0 : i64, tpu.core_type = #tpu.core_type<tc>} {
    %c0 = arith.constant 0 : index
    %c0_0 = arith.constant 0 : index
    %0 = vector.load %arg0[%c0, %c0_0] : memref<16x128xbf16, #tpu.memory_space<vmem>>, vector<16x128xbf16>
    %c0_1 = arith.constant 0 : index
    %c0_2 = arith.constant 0 : index
    %1 = vector.load %arg1[%c0_1, %c0_2] : memref<16x128xf32, #tpu.memory_space<vmem>>, vector<16x128xf32>
    %2 = arith.truncf %1 : vector<16x128xf32> to vector<16x128xbf16>
    %c0_3 = arith.constant 0 : index
    %c0_4 = arith.constant 0 : index
    %3 = vector.load %arg2[%c0_3, %c0_4] : memref<128x384xbf16, #tpu.memory_space<vmem>>, vector<128x384xbf16>
    %cst = arith.constant dense<0.000000e+00> : vector<16x384xf32>
    %4 = tpu.matmul %0, %3, %cst {dimension_numbers = #tpu.dot_dimension_numbers<[1], [0], [0], [1], [0, 0, 1, 1], [], []>} : vector<16x128xbf16>, vector<128x384xbf16>, vector<16x384xf32> -> vector<16x384xf32>
    %c0_5 = arith.constant 0 : index
    %c0_6 = arith.constant 0 : index
    %5 = vector.load %arg4[%c0_5, %c0_6] : memref<1x384xf32, #tpu.memory_space<vmem>>, vector<1x384xf32>
    %6 = vector.broadcast %5 : vector<1x384xf32> to vector<16x384xf32>
    %7 = arith.addf %4, %6 : vector<16x384xf32>
    %c0_7 = arith.constant 0 : index
    %c0_8 = arith.constant 0 : index
    %8 = vector.load %arg3[%c0_7, %c0_8] : memref<128x384xbf16, #tpu.memory_space<vmem>>, vector<128x384xbf16>
    %cst_9 = arith.constant dense<0.000000e+00> : vector<16x384xf32>
    %9 = tpu.matmul %2, %8, %cst_9 {dimension_numbers = #tpu.dot_dimension_numbers<[1], [0], [0], [1], [0, 0, 1, 1], [], []>} : vector<16x128xbf16>, vector<128x384xbf16>, vector<16x384xf32> -> vector<16x384xf32>
    %10 = vector.extract_strided_slice %7 {offsets = [0, 0], sizes = [16, 128], strides = [1, 1]} : vector<16x384xf32> to vector<16x128xf32>
    %11 = vector.extract_strided_slice %9 {offsets = [0, 0], sizes = [16, 128], strides = [1, 1]} : vector<16x384xf32> to vector<16x128xf32>
    %12 = arith.addf %10, %11 : vector<16x128xf32>
    %13 = arith.negf %12 : vector<16x128xf32>
    %14 = math.exp %13 : vector<16x128xf32>
    %cst_10 = arith.constant 1.000000e+00 : f32
    %15 = vector.broadcast %cst_10 : f32 to vector<16x128xf32>
    %16 = arith.addf %15, %14 : vector<16x128xf32>
    %17 = arith.divf %15, %16 : vector<16x128xf32>
    %18 = vector.extract_strided_slice %7 {offsets = [0, 128], sizes = [16, 128], strides = [1, 1]} : vector<16x384xf32> to vector<16x128xf32>
    %19 = vector.extract_strided_slice %9 {offsets = [0, 128], sizes = [16, 128], strides = [1, 1]} : vector<16x384xf32> to vector<16x128xf32>
    %20 = arith.addf %18, %19 : vector<16x128xf32>
    %21 = arith.negf %20 : vector<16x128xf32>
    %22 = math.exp %21 : vector<16x128xf32>
    %cst_11 = arith.constant 1.000000e+00 : f32
    %23 = vector.broadcast %cst_11 : f32 to vector<16x128xf32>
    %24 = arith.addf %23, %22 : vector<16x128xf32>
    %25 = arith.divf %23, %24 : vector<16x128xf32>
    %26 = vector.extract_strided_slice %7 {offsets = [0, 256], sizes = [16, 128], strides = [1, 1]} : vector<16x384xf32> to vector<16x128xf32>
    %27 = vector.extract_strided_slice %9 {offsets = [0, 256], sizes = [16, 128], strides = [1, 1]} : vector<16x384xf32> to vector<16x128xf32>
    %c0_12 = arith.constant 0 : index
    %c0_13 = arith.constant 0 : index
    %28 = vector.load %arg5[%c0_12, %c0_13] : memref<1x128xf32, #tpu.memory_space<vmem>>, vector<1x128xf32>
    %29 = vector.broadcast %28 : vector<1x128xf32> to vector<16x128xf32>
    %30 = arith.addf %27, %29 : vector<16x128xf32>
    %31 = arith.mulf %17, %30 : vector<16x128xf32>
    %32 = arith.addf %26, %31 : vector<16x128xf32>
    %33 = math.tanh %32 : vector<16x128xf32>
    %cst_14 = arith.constant 1.000000e+00 : f32
    %34 = vector.broadcast %cst_14 : f32 to vector<16x128xf32>
    %35 = arith.subf %34, %25 : vector<16x128xf32>
    %36 = arith.mulf %35, %33 : vector<16x128xf32>
    %37 = arith.mulf %25, %1 : vector<16x128xf32>
    %38 = arith.addf %36, %37 : vector<16x128xf32>
    %c0_15 = arith.constant 0 : index
    %c0_16 = arith.constant 0 : index
    %39 = vector.load %arg6[%c0_15, %c0_16] : memref<16x128xf32, #tpu.memory_space<vmem>>, vector<16x128xf32>
    tpu.vector_store %arg6[%c0_15, %c0_16], %38 {strides = array<i32>} : memref<16x128xf32, #tpu.memory_space<vmem>>, vector<16x128xf32>,
    %40 = arith.truncf %38 : vector<16x128xf32> to vector<16x128xbf16>
    %c0_17 = arith.constant 0 : index
    %c0_18 = arith.constant 0 : index
    %41 = vector.load %arg7[%c0_17, %c0_18] : memref<16x128xbf16, #tpu.memory_space<vmem>>, vector<16x128xbf16>
    tpu.vector_store %arg7[%c0_17, %c0_18], %40 {strides = array<i32>} : memref<16x128xbf16, #tpu.memory_space<vmem>>, vector<16x128xbf16>,
    return
  }
}

</mosaic_0001>

<bundles_post_ra>
// kernel: decoder_forward.3
= control target key start
LH: loop header
LB: loop body
LE: loop exit
PB: predicated region body
PF: predicated region fallthrough
CT: control target
= control target key end

     0   :  { %v191_v0 = vmov 0.0   ;;  %vm192_vm0 = vmmov 0   ;;  %s249_s1 = inlined_call_operand.vmem [shape: bf16[128,128], index: 1, kind: input, shape index: {}]   ;;  %s250_s0 = inlined_call_operand.vmem [shape: bf16[16,128], index: 0, kind: input, shape index: {}]   ;;  %s251_s2 = inlined_call_operand.vmem [shape: f32[1,128], index: 2, kind: input, shape index: {}]   ;;  %s252_s3 = inlined_call_operand.vmem [shape: f32[16,128], index: 3, kind: output, shape index: {}]  }
   0x1   :  { %160 = vmatprep.subr.bf16.mxu0 %v191_v0  ;;  %v182_v1 = vld [vmem:[%s249_s1 + $0x38] sm:$0xff]   ;;  %176 = vmatprep.mubr.msk.bf16.mxu0 %vm192_vm0, %v191_v0  ;;  %v183_v2 = vld [vmem:[%s249_s1 + $0x30] sm:$0xff]   ;;  %v184_v3 = vld [vmem:[%s249_s1 + $0x28] sm:$0xff]  }
   0x2   :  { %161 = vmatpush3.bf16.msra.mxu0 %v182_v1  ;;  %v185_v4 = vld [vmem:[%s249_s1 + $0x20] sm:$0xff]   ;;  %v186_v5 = vld [vmem:[%s249_s1 + $0x18] sm:$0xff]   ;;  %v187_v6 = vld [vmem:[%s249_s1 + $0x10] sm:$0xff]  }
   0x3   :  { %162 = vmatprep.subr.bf16.mxu0 %v191_v0  ;;  %v188_v7 = vld [vmem:[%s249_s1 + $0x8] sm:$0xff]   ;;  %v189_v8 = vld [vmem:[%s249_s1] sm:$0xff]  }
   0x4   :  { %v190_v9 = vld [vmem:[%s250_s0] sm:$0xff]  }
   0x5   :  { %v141_v10 = vld [vmem:[%s251_s2] ss:$0 sm:$0xff] }
   0x6   :  { %163 = vmatpush3.bf16.msra.mxu0 %v183_v2 }
   0x7   :  { %164 = vmatprep.subr.bf16.mxu0 %v191_v0 }
   0xa   :  { %165 = vmatpush3.bf16.msra.mxu0 %v184_v3 }
   0xb   :  { %166 = vmatprep.subr.bf16.mxu0 %v191_v0 }
   0xe   :  { %167 = vmatpush3.bf16.msra.mxu0 %v185_v4 }
   0xf   :  { %168 = vmatprep.subr.bf16.mxu0 %v191_v0 }
  0x12   :  { %169 = vmatpush3.bf16.msra.mxu0 %v186_v5 }
  0x13   :  { %170 = vmatprep.subr.bf16.mxu0 %v191_v0 }
  0x16   :  { %171 = vmatpush3.bf16.msra.mxu0 %v187_v6 }
  0x17   :  { %172 = vmatprep.subr.bf16.mxu0 %v191_v0 }
  0x1a   :  { %173 = vmatpush3.bf16.msra.mxu0 %v188_v7 }
  0x1b   :  { %174 = vmatprep.subr.bf16.mxu0 %v191_v0 }
  0x1e   :  { %175 = vmatpush3.bf16.msra.mxu0 %v189_v8 }
  0x21   :  { %177 = vmatmul.mubr.bf16.vlgmr.msra.gmra.mxu0 %v190_v9 }
  0xe1   :  { %v128_v11 = vpop.f32.mrf.mxu0 }
  0xe2   :  { %v129_v12 = vadd.f32 %v141_v10, %v128_v11 }
  0xe3   :  { %v178_v13 = vpop.f32.mrf.mxu0 }
  0xe4   :  { %135 = vst [vmem:[%s252_s3] sm:$0xff] %v129_v12 }
  0xe5   :  { %v131_v14 = vpop.f32.mrf.mxu0 }
  0xe6   :  { %v132_v15 = vadd.f32 %v141_v10, %v131_v14 }
  0xe7   :  { %v179_v16 = vpop.f32.mrf.mxu0 }
  0xe8   :  { %136 = vst [vmem:[%s252_s3 + $0x8] sm:$0xff] %v132_v15 }

// kernel: decoder_forward.2
= control target key start
LH: loop header
LB: loop body
LE: loop exit
PB: predicated region body
PF: predicated region fallthrough
CT: control target
= control target key end

     0   :  { %13 = vsyncpa [#allocation3], 0  ;;  %s1007_s0 = inlined_call_operand.vmem [shape: bf16[16,128], index: 0, kind: input, shape index: {}]   ;;  %s1008_s1 = inlined_call_operand.vmem [shape: f32[16,128], index: 1, kind: input, shape index: {}]   ;;  %s1009_s2 = inlined_call_operand.hbm [shape: bf16[128,384], index: 2, kind: input, shape index: {}]   ;;  %s1010_s3 = inlined_call_operand.hbm [shape: bf16[128,384], index: 3, kind: input, shape index: {}]   ;;  %s1011_s4 = inlined_call_operand.vmem [shape: f32[1,384], index: 4, kind: input, shape index: {}]   ;;  %s1012_s5 = inlined_call_operand.vmem [shape: f32[1,128], index: 5, kind: input, shape index: {}]   ;;  %s1013_s6 = inlined_call_operand.vmem [shape: f32[16,128], index: 6, kind: output, shape index: {0}]   ;;  %s1014_s7 = inlined_call_operand.vmem [shape: bf16[16,128], index: 7, kind: output, shape index: {1}]  }
   0x1   :  { %14 = vsyncpa [#allocation5], 0  ;;  %s900_s24 = smov [#allocation2]  }
   0x2   :  { %s24_s25 = sshll.u32 %s900_s24, 4  ;;  %s25_s25 = int_to_ptr.vmem [resolvable:$true] %s24_s25 }
   0x3   :  { %s864_s26 = scalar_lea.vmem %s25_s25, 3072  ;;  %p869_p1 = scmp.lt.s32.totalorder %s25_s25, %s25_s25 }
   0x4   :  { %p865_p0 = scmp.ne.s32.totalorder %s25_s25, %s864_s26  ;;  %p870_p2 = scmp.lt.s32.totalorder %s864_s26, %s864_s26 }
   0x6   :  { %p871_p3 = por %p870_p2, %p869_p1 }
   0x8   :  { %p872_p4 = pnand %p871_p3, %p865_p0 }
   0xa   :  { %875 = shalt.err (!%p872_p4)
}
   0xb   :  { %s901_s27 = smov 192   ;;  %s902_s28 = smov 12  }
   0xc   :  { %30 = dma.hbm_to_vmem [thread:$0]  %s1009_s2, 3072, %s25_s25, [#allocation3], %s901_s27, %s901_s27, %s902_s28  }
   0xd   :  { %s903_s8 = smov [#allocation4]  }
   0xe   :  { %s36_s9 = sshll.u32 %s903_s8, 4  ;;  %s37_s9 = int_to_ptr.vmem [resolvable:$true] %s36_s9 }
   0xf   :  { %s884_s10 = scalar_lea.vmem %s37_s9, 3072  ;;  %p889_p6 = scmp.lt.s32.totalorder %s37_s9, %s37_s9 }
  0x10   :  { %p885_p5 = scmp.ne.s32.totalorder %s37_s9, %s884_s10  ;;  %p890_p7 = scmp.lt.s32.totalorder %s884_s10, %s884_s10 }
  0x12   :  { %p891_p8 = por %p890_p7, %p889_p6 }
  0x14   :  { %p892_p9 = pnand %p891_p8, %p885_p5 }
  0x16   :  { %895 = shalt.err (!%p892_p9)
}
  0x17   :  { %42 = dma.hbm_to_vmem [thread:$0]  %s1010_s3, 3072, %s37_s9, [#allocation5], %s901_s27, %s901_s27, %s902_s28  }
  0x18   :  { %896 = dma.done.wait [#allocation3], 3072  }
  0x19   :  { %897 = vsyncadd [#allocation3], 4294964224 }
  0x1a   :  { %898 = dma.done.wait [#allocation5], 3072  }
  0x1b   :  { %899 = vsyncadd [#allocation5], 4294964224  ;;  %v904_v0 = vmov 0.0   ;;  %v905_v1 = vmov 0   ;;  %vm906_vm0 = vmmov 0   ;;  %v797_v25 = vld [vmem:[%s1007_s0] sm:$0xff]   ;;  %v93_v57 = vlaneseq }
  0x1c   :  { %724 = vmatprep.subr.bf16.mxu1 %v904_v0  ;;  %274 = vmatprep.mubr.bf16.mxu0 %v905_v1  ;;  %v771_v2 = vld [vmem:[#allocation2 + $0xac] ss:$12 sps:$4 sm:$0xff]   ;;  %v773_v3 = vld [vmem:[#allocation2 + $0xa8] ss:$12 sps:$4 sm:$0xff]   ;;  %v776_v5 = vld [vmem:[#allocation2 + $0x90] ss:$12 sps:$4 sm:$0xff]  }
  0x1d   :  { %740 = vmatprep.mubr.msk.bf16.mxu1 %vm906_vm0, %v904_v0  ;;  %242 = vmatprep.subr.bf16.mxu0 %v771_v2  ;;  %v774_v4 = vld [vmem:[#allocation2 + $0x94] ss:$12 sps:$4 sm:$0xff]   ;;  %v777_v6 = vld [vmem:[#allocation2 + $0x7c] ss:$12 sps:$4 sm:$0xff]   ;;  %v779_v7 = vld [vmem:[#allocation2 + $0x78] ss:$12 sps:$4 sm:$0xff]  }
  0x1e   :  { %243 = vmatpush1.bf16.msra.mxu0 %v773_v3  ;;  %v780_v8 = vld [vmem:[#allocation2 + $0x64] ss:$12 sps:$4 sm:$0xff]   ;;  %v782_v10 = vld [vmem:[#allocation2 + $0x60] ss:$12 sps:$4 sm:$0xff]   ;;  %v785_v13 = vld [vmem:[#allocation2 + $0x48] ss:$12 sps:$4 sm:$0xff]  }
  0x1f   :  { %244 = vmatprep.subr.bf16.mxu0 %v774_v4  ;;  %v792_v9 = vld [vmem:[#allocation2 + $0xb0] ss:$12 sps:$4 sm:$0xff]   ;;  %v783_v11 = vld [vmem:[#allocation2 + $0x4c] ss:$12 sps:$4 sm:$0xff]   ;;  %v786_v14 = vld [vmem:[#allocation2 + $0x34] ss:$12 sps:$4 sm:$0xff]  }
  0x20   :  { %725 = vmatpush3.bf16.msra.mxu1 %v792_v9  ;;  %v796_v12 = vld [vmem:[#allocation2 + $0x98] ss:$12 sps:$4 sm:$0xff]   ;;  %v801_v15 = vld [vmem:[#allocation2 + $0x80] ss:$12 sps:$4 sm:$0xff]   ;;  %v788_v16 = vld [vmem:[#allocation2 + $0x30] ss:$12 sps:$4 sm:$0xff]  }
  0x21   :  { %726 = vmatprep.subr.bf16.mxu1 %v904_v0  ;;  %v789_v17 = vld [vmem:[#allocation2 + $0x1c] ss:$12 sps:$4 sm:$0xff]   ;;  %v791_v19 = vld [vmem:[#allocation2 + $0x18] ss:$12 sps:$4 sm:$0xff]   ;;  %v795_v22 = vld [vmem:[#allocation2] ss:$12 sps:$4 sm:$0xff]  }
  0x22   :  { %245 = vmatpush1.bf16.msra.mxu0 %v776_v5  ;;  %v805_v18 = vld [vmem:[#allocation2 + $0x68] ss:$12 sps:$4 sm:$0xff]   ;;  %v793_v20 = vld [vmem:[#allocation2 + $0x4] ss:$12 sps:$4 sm:$0xff]   ;;  %v800_v23 = vld [vmem:[#allocation4 + $0xac] ss:$12 sps:$4 sm:$0xff]  }
  0x23   :  { %246 = vmatprep.subr.bf16.mxu0 %v777_v6  ;;  %v809_v21 = vld [vmem:[#allocation2 + $0x50] ss:$12 sps:$4 sm:$0xff]   ;;  %v813_v24 = vld [vmem:[#allocation2 + $0x38] ss:$12 sps:$4 sm:$0xff]   ;;  %v798_v26 = vld [vmem:[#allocation4 + $0xa8] ss:$12 sps:$4 sm:$0xff]  }
  0x24   :  { %727 = vmatpush3.bf16.msra.mxu1 %v796_v12  ;;  %v804_v27 = vld [vmem:[#allocation4 + $0x94] ss:$12 sps:$4 sm:$0xff]   ;;  %v802_v29 = vld [vmem:[#allocation4 + $0x90] ss:$12 sps:$4 sm:$0xff]   ;;  %v806_v32 = vld [vmem:[#allocation4 + $0x78] ss:$12 sps:$4 sm:$0xff]  }
  0x25   :  { %728 = vmatprep.subr.bf16.mxu1 %v904_v0  ;;  %v817_v28 = vld [vmem:[#allocation2 + $0x20] ss:$12 sps:$4 sm:$0xff]   ;;  %v808_v30 = vld [vmem:[#allocation4 + $0x7c] ss:$12 sps:$4 sm:$0xff]   ;;  %v812_v33 = vld [vmem:[#allocation4 + $0x64] ss:$12 sps:$4 sm:$0xff]  }
  0x26   :  { %247 = vmatpush1.bf16.msra.mxu0 %v779_v7  ;;  %v821_v31 = vld [vmem:[#allocation2 + $0x8] ss:$12 sps:$4 sm:$0xff]   ;;  %v825_v34 = vld [vmem:[#allocation4 + $0xb0] ss:$12 sps:$4 sm:$0xff]   ;;  %v810_v35 = vld [vmem:[#allocation4 + $0x60] ss:$12 sps:$4 sm:$0xff]  }
  0x27   :  { %248 = vmatprep.subr.bf16.mxu0 %v780_v8  ;;  %v816_v36 = vld [vmem:[#allocation4 + $0x4c] ss:$12 sps:$4 sm:$0xff]   ;;  %v814_v38 = vld [vmem:[#allocation4 + $0x48] ss:$12 sps:$4 sm:$0xff]   ;;  %v818_v41 = vld [vmem:[#allocation4 + $0x30] ss:$12 sps:$4 sm:$0xff]  }
  0x28   :  { %729 = vmatpush3.bf16.msra.mxu1 %v801_v15  ;;  %v829_v37 = vld [vmem:[#allocation4 + $0x98] ss:$12 sps:$4 sm:$0xff]   ;;  %v820_v39 = vld [vmem:[#allocation4 + $0x34] ss:$12 sps:$4 sm:$0xff]   ;;  %v824_v42 = vld [vmem:[#allocation4 + $0x1c] ss:$12 sps:$4 sm:$0xff]  }
  0x29   :  { %730 = vmatprep.subr.bf16.mxu1 %v904_v0  ;;  %v830_v40 = vld [vmem:[#allocation4 + $0x80] ss:$12 sps:$4 sm:$0xff]   ;;  %v831_v43 = vld [vmem:[#allocation4 + $0x68] ss:$12 sps:$4 sm:$0xff]   ;;  %v822_v44 = vld [vmem:[#allocation4 + $0x18] ss:$12 sps:$4 sm:$0xff]  }
  0x2a   :  { %249 = vmatpush1.bf16.msra.mxu0 %v782_v10  ;;  %v828_v45 = vld [vmem:[#allocation4 + $0x4] ss:$12 sps:$4 sm:$0xff]   ;;  %v826_v47 = vld [vmem:[#allocation4] ss:$12 sps:$4 sm:$0xff]   ;;  %v835_v53 = vld [vmem:[#allocation4 + $0x8] ss:$12 sps:$4 sm:$0xff]  }
  0x2b   :  { %250 = vmatprep.subr.bf16.mxu0 %v783_v11  ;;  %v832_v46 = vld [vmem:[#allocation4 + $0x50] ss:$12 sps:$4 sm:$0xff]   ;;  %v978_v48 = vld [vmem:[%s1008_s1] sm:$0xff]  ;;  %v983_v49 = vld [vmem:[%s1008_s1 + $0x8] sm:$0xff]  ;;  %v94_v60 = vshrl.u32 %v93_v57, 7 }
  0x2c   :  { %731 = vmatpush3.bf16.msra.mxu1 %v805_v18  ;;  %v833_v50 = vld [vmem:[#allocation4 + $0x38] ss:$12 sps:$4 sm:$0xff]   ;;  %v58_v51 = vpack.c.bf16 %v983_v49, %v978_v48  ;;  %v834_v52 = vld [vmem:[#allocation4 + $0x20] ss:$12 sps:$4 sm:$0xff]  }
  0x2d   :  { %732 = vmatprep.subr.bf16.mxu1 %v904_v0  ;;  %v95_v62 = vsub.s32 0, %v94_v60  ;;  %v91_v63 = vld [vmem:[%s1011_s4] sm:$0x7]  ;;  %v99_v3 = vsub.s32 1, %v94_v60 }
  0x2e   :  { %251 = vmatpush1.bf16.msra.mxu0 %v785_v13 }
  0x2f   :  { %252 = vmatprep.subr.bf16.mxu0 %v786_v14  ;;  %v96_v2 = vrot.slane %v91_v63, %v95_v62  ;;  %v100_v6 = vrot.slane %v91_v63, %v99_v3 }
  0x30   :  { %733 = vmatpush3.bf16.msra.mxu1 %v809_v21 }
  0x31   :  { %734 = vmatprep.subr.bf16.mxu1 %v904_v0 }
  0x32   :  { %253 = vmatpush1.bf16.msra.mxu0 %v788_v16 }
  0x33   :  { %254 = vmatprep.subr.bf16.mxu0 %v789_v17 }
  0x34   :  { %735 = vmatpush3.bf16.msra.mxu1 %v813_v24 }
  0x35   :  { %736 = vmatprep.subr.bf16.mxu1 %v904_v0 }
  0x36   :  { %255 = vmatpush1.bf16.msra.mxu0 %v791_v19 }
  0x37   :  { %256 = vmatprep.subr.bf16.mxu0 %v793_v20 }
  0x38   :  { %737 = vmatpush3.bf16.msra.mxu1 %v817_v28 }
  0x39   :  { %738 = vmatprep.subr.bf16.mxu1 %v904_v0 }
  0x3a   :  { %257 = vmatpush1.bf16.msra.mxu0 %v795_v22 }
  0x3b   :  { %486 = vmatprep.subr.bf16.mxu0 %v800_v23 }
  0x3c   :  { %739 = vmatpush3.bf16.msra.mxu1 %v821_v31  ;;  %v696_v31 = vld [vmem:[%s1012_s5] ss:$0 sm:$0xff] }
  0x3d   :  { %275 = vmatmul.mubr.bf16.vlgmr.msra.gmra.mxu0 %v797_v25  ;;  %744 = vmatprep.subr.bf16.mxu1 %v904_v0 }
  0x3e   :  { %487 = vmatpush1.bf16.msra.mxu0 %v798_v26  ;;  %518 = vmatprep.mubr.bf16.mxu0 %v905_v1 }
  0x3f   :  { %488 = vmatprep.subr.bf16.mxu0 %v804_v27  ;;  %741 = vmatmul.mubr.bf16.vlgmr.msra.gmra.mxu1 %v797_v25 }
  0x40   :  { %745 = vmatpush3.bf16.msra.mxu1 %v825_v34  ;;  %760 = vmatprep.mubr.msk.bf16.mxu1 %vm906_vm0, %v904_v0 }
  0x41   :  { %746 = vmatprep.subr.bf16.mxu1 %v904_v0 }
  0x42   :  { %489 = vmatpush1.bf16.msra.mxu0 %v802_v29  ;;  %v103_v29 = vsub.s32 2, %v94_v60 }
  0x43   :  { %490 = vmatprep.subr.bf16.mxu0 %v808_v30 }
  0x44   :  { %747 = vmatpush3.bf16.msra.mxu1 %v829_v37 }
  0x45   :  { %748 = vmatprep.subr.bf16.mxu1 %v904_v0 }
  0x46   :  { %491 = vmatpush1.bf16.msra.mxu0 %v806_v32 }
  0x47   :  { %492 = vmatprep.subr.bf16.mxu0 %v812_v33  ;;  %v104_v33 = vrot.slane %v91_v63, %v103_v29 }
  0x48   :  { %749 = vmatpush3.bf16.msra.mxu1 %v830_v40 }
  0x49   :  { %750 = vmatprep.subr.bf16.mxu1 %v904_v0 }
  0x4a   :  { %493 = vmatpush1.bf16.msra.mxu0 %v810_v35 }
  0x4b   :  { %494 = vmatprep.subr.bf16.mxu0 %v816_v36 }
  0x4c   :  { %751 = vmatpush3.bf16.msra.mxu1 %v831_v43 }
  0x4d   :  { %752 = vmatprep.subr.bf16.mxu1 %v904_v0 }
  0x4e   :  { %495 = vmatpush1.bf16.msra.mxu0 %v814_v38 }
  0x4f   :  { %496 = vmatprep.subr.bf16.mxu0 %v820_v39 }
  0x50   :  { %753 = vmatpush3.bf16.msra.mxu1 %v832_v46 }
  0x51   :  { %754 = vmatprep.subr.bf16.mxu1 %v904_v0 }
  0x52   :  { %497 = vmatpush1.bf16.msra.mxu0 %v818_v41 }
  0x53   :  { %498 = vmatprep.subr.bf16.mxu0 %v824_v42 }
  0x54   :  { %755 = vmatpush3.bf16.msra.mxu1 %v833_v50 }
  0x55   :  { %756 = vmatprep.subr.bf16.mxu1 %v904_v0 }
  0x56   :  { %499 = vmatpush1.bf16.msra.mxu0 %v822_v44 }
  0x57   :  { %500 = vmatprep.subr.bf16.mxu0 %v828_v45 }
  0x58   :  { %757 = vmatpush3.bf16.msra.mxu1 %v834_v52 }
  0x59   :  { %758 = vmatprep.subr.bf16.mxu1 %v904_v0 }
  0x5a   :  { %501 = vmatpush1.bf16.msra.mxu0 %v826_v47 }
  0x5c   :  { %759 = vmatpush3.bf16.msra.mxu1 %v835_v53 }
  0x5d   :  { %519 = vmatmul.mubr.bf16.vlgmr.msra.gmra.mxu0 %v58_v51 }
  0x5f   :  { %761 = vmatmul.mubr.bf16.vlgmr.msra.gmra.mxu1 %v58_v51 }
  0xfd   :  { %v276_v59 = vpop.f32.mrf.mxu0 }
  0xfe   :  { %v277_v0 = vadd.f32 %v276_v59, %v96_v2 }
  0xff   :  { %v319_v54 = vpop.f32.mrf.mxu1  ;;  %v278_v61 = vpop.f32.mrf.mxu0 }
 0x100   :  { %v279_v12 = vadd.f32 %v278_v61, %v100_v6  ;;  %v320_v38 = vadd.f32 %v319_v54, %v104_v33 }
 0x101   :  { %v742_v55 = vpop.f32.mrf.mxu1  ;;  %v280_v1 = vpop.f32.mrf.mxu0 }
 0x102   :  { %v281_v9 = vadd.f32 %v280_v1, %v96_v2 }
 0x103   :  { %v322_v56 = vpop.f32.mrf.mxu1  ;;  %v282_v4 = vpop.f32.mrf.mxu0 }
 0x104   :  { %v283_v17 = vadd.f32 %v282_v4, %v100_v6  ;;  %v323_v43 = vadd.f32 %v322_v56, %v104_v33 }
 0x105   :  { %v743_v58 = vpop.f32.mrf.mxu1 }
 0x11d   :  { %v520_v5 = vpop.f32.mrf.mxu0 }
 0x11e   :  { %v570_v7 = vadd.f32 %v520_v5, %v277_v0 }
 0x11f   :  { %v522_v8 = vpop.f32.mrf.mxu0  ;;  %v563_v18 = vpop.f32.mrf.mxu1 }
 0x120   :  { %v692_v10 = vmul.f32 -1.442695, %v570_v7  ;;  %v584_v14 = vadd.f32 %v522_v8, %v279_v12  ;;  %v605_v35 = vadd.f32 %v696_v31, %v563_v18 }
 0x121   :  { %v524_v11 = vpop.f32.mrf.mxu0  ;;  %v762_v21 = vpop.f32.mrf.mxu1 }
 0x122   :  { %836 = vpow2.f32 %v692_v10  ;;  %v571_v13 = vadd.f32 %v524_v11, %v281_v9  ;;  %v694_v20 = vmul.f32 -1.442695, %v584_v14 }
 0x123   :  { %v526_v16 = vpop.f32.mrf.mxu0  ;;  %v566_v22 = vpop.f32.mrf.mxu1 }
 0x124   :  { %v693_v15 = vmul.f32 -1.442695, %v571_v13  ;;  %v585_v19 = vadd.f32 %v526_v16, %v283_v17  ;;  %v606_v41 = vadd.f32 %v696_v31, %v566_v22 }
 0x125   :  { %v763_v24 = vpop.f32.mrf.mxu1 }
 0x126   :  { %838 = vpow2.f32 %v693_v15  ;;  %v695_v23 = vmul.f32 -1.442695, %v585_v19 }
 0x127   :  { %840 = vpow2.f32 %v694_v20 }
 0x128   :  { %842 = vpow2.f32 %v695_v23 }
 0x12f   :  { %v837_v25 = vpop.eup %836 }
 0x130   :  { %v578_v26 = vadd.f32 1.0, %v837_v25 }
 0x132   :  { %844 = vrcp.f32 %v578_v26 }
 0x133   :  { %v839_v27 = vpop.eup %838 }
 0x134   :  { %v579_v28 = vadd.f32 1.0, %v839_v27  ;;  %v841_v30 = vpop.eup %840 }
 0x135   :  { %v843_v32 = vpop.eup %842  ;;  %v592_v34 = vadd.f32 1.0, %v841_v30 }
 0x136   :  { %846 = vrcp.f32 %v579_v28  ;;  %v593_v37 = vadd.f32 1.0, %v843_v32 }
 0x137   :  { %848 = vrcp.f32 %v592_v34 }
 0x138   :  { %850 = vrcp.f32 %v593_v37 }
 0x13f   :  { %v845_v36 = vpop.eup %844 }
 0x140   :  { %v607_v39 = vmul.f32 %v845_v36, %v605_v35 }
 0x142   :  { %v609_v40 = vadd.f32 %v607_v39, %v320_v38 }
 0x143   :  { %v847_v42 = vpop.eup %846 }
 0x144   :  { %852 = vtanh.f32 %v609_v40  ;;  %v608_v44 = vmul.f32 %v847_v42, %v606_v41  ;;  %v849_v46 = vpop.eup %848 }
 0x145   :  { %v851_v47 = vpop.eup %850  ;;  %v613_v50 = vsub.f32 1.0, %v849_v46  ;;  %v617_v52 = vmul.f32 %v849_v46, %v978_v48 }
 0x146   :  { %v610_v45 = vadd.f32 %v608_v44, %v323_v43  ;;  %v614_v55 = vsub.f32 1.0, %v851_v47  ;;  %v618_v58 = vmul.f32 %v851_v47, %v983_v49 }
 0x148   :  { %854 = vtanh.f32 %v610_v45 }
 0x151   :  { %v853_v51 = vpop.eup %852 }
 0x152   :  { %v615_v53 = vmul.f32 %v853_v51, %v613_v50 }
 0x154   :  { %v619_v54 = vadd.f32 %v617_v52, %v615_v53 }
 0x155   :  { %v855_v57 = vpop.eup %854 }
 0x156   :  { %621 = vst [vmem:[%s1013_s6] sm:$0xff] %v619_v54  ;;  %v616_v56 = vmul.f32 %v855_v57, %v614_v55 }
 0x158   :  { %v620_v59 = vadd.f32 %v618_v58, %v616_v56 }
 0x15a   :  { %622 = vst [vmem:[%s1013_s6 + $0x8] sm:$0xff] %v620_v59  ;;  %v704_v60 = vpack.c.bf16 %v620_v59, %v619_v54 }
 0x15c   :  { %705 = vst [vmem:[%s1014_s7] sm:$0xff] %v704_v60  }
 0x15d   :  { %641 = vsyncpa [#allocation3], 1 }
 0x15e   :  { %642 = vsyncpa [#allocation5], 1 }

</bundles_post_ra>
